<compile_context>
chip_gen: v5e
topology: v5e:2x2
jax: 0.10.0
libtpu: 0.0.40
codegen_flags: <defaults>
</compile_context>

<pallas_src>
import functools

import jax
import jax.numpy as jnp
from jax.experimental import pallas as pl
from jax.experimental.pallas import tpu as pltpu


def _se_pool_kernel(x_ref, w1t_ref, w2_ref, s_ref, acc_ref, *, inv_hw):
    """Pass 1: accumulate the spatial mean, then run the tiny FC stack."""
    k = pl.program_id(1)

    @pl.when(k == 0)
    def _init():
        acc_ref[...] = jnp.zeros_like(acc_ref)

    # Partial spatial sum for this HW tile; accumulate in f32 only (input tile
    # stays in its own dtype).
    acc_ref[...] += jnp.sum(x_ref[...], axis=-1, keepdims=True,
                            dtype=jnp.float32)

    @pl.when(k == pl.num_programs(1) - 1)
    def _finalize():
        pooled = acc_ref[0] * inv_hw                     # (C, 1) f32, C on sublanes
        w1t = w1t_ref[...].astype(jnp.float32)           # (C, Cr)
        w2 = w2_ref[...].astype(jnp.float32)             # (C, Cr)
        # fc1 + ReLU:  h_j = relu(sum_c W1[j, c] * pooled_c)      -> (1, Cr)
        h = jnp.maximum(jnp.sum(w1t * pooled, axis=0, keepdims=True), 0.0)
        # fc2 + sigmoid:  s_c = sigmoid(sum_j W2[c, j] * h_j)     -> (C, 1)
        s = jax.nn.sigmoid(jnp.sum(w2 * h, axis=-1, keepdims=True))
        s_ref[...] = s[None, :, :]                       # (1, C, 1) f32


def _se_scale_kernel(x_ref, s_ref, o_ref):
    """Pass 2: out = x * s, s broadcast over the lane-dense HW axis."""
    o_ref[...] = x_ref[...] * s_ref[...].astype(o_ref.dtype)


def _pick_hw_tile(hw, c, itemsize, max_tile_bytes):
    """Largest 128-multiple divisor of hw under the byte cap (or hw itself)."""
    cap_elems = max(128, max_tile_bytes // (c * itemsize))
    if hw <= cap_elems:
        return hw
    t = (cap_elems // 128) * 128
    while t >= 128:
        if hw % t == 0:
            return t
        t -= 128
    # No 128-multiple divisor under the cap: fall back to a full-image block
    # (keeps correctness; padding/masking a ragged tail is not needed here).
    return hw


def se_module_forward(x_nchw, w1, w2, *, max_tile_bytes=4 * 1024 * 1024):
    """SEModule forward. x: (N,C,H,W); w1: (Cr,C,1,1); w2: (C,Cr,1,1) (PyTorch layout)."""
    N, C, H, W = x_nchw.shape
    Cr = w1.shape[0]
    HW = H * W
    itemsize = jnp.dtype(x_nchw.dtype).itemsize

    # NCHW kept as-is: (N, C, HW) is a free, contiguous reshape (no transpose).
    x = x_nchw.reshape(N, C, HW)
    # Only the tiny weights get re-laid-out for the in-kernel FC.
    w1t = jnp.transpose(w1.reshape(Cr, C), (1, 0))   # (C, Cr)
    w2m = w2.reshape(C, Cr)                          # (C, Cr)

    tile_hw = _pick_hw_tile(HW, C, itemsize, max_tile_bytes)
    num_k = HW // tile_hw
    vmem_limit = 32 * 1024 * 1024

    # ---- pass 1: pooled -> fc1 -> relu -> fc2 -> sigmoid  =>  s: (N, C, 1) f32
    pool_cost = pl.CostEstimate(
        flops=int(N * C * HW + 4 * N * C * Cr),
        transcendentals=int(N * C),
        bytes_accessed=int(N * C * HW * itemsize + 2 * C * Cr * itemsize + N * C * 4),
    )
    s = pl.pallas_call(
        functools.partial(_se_pool_kernel, inv_hw=1.0 / HW),
        out_shape=jax.ShapeDtypeStruct((N, C, 1), jnp.float32),
        grid_spec=pltpu.PrefetchScalarGridSpec(
            num_scalar_prefetch=0,
            grid=(N, num_k),
            in_specs=[
                pl.BlockSpec((1, C, tile_hw), lambda i, k: (i, 0, k)),
                pl.BlockSpec((C, Cr), lambda i, k: (0, 0)),
                pl.BlockSpec((C, Cr), lambda i, k: (0, 0)),
            ],
            out_specs=pl.BlockSpec((1, C, 1), lambda i, k: (i, 0, 0)),
            scratch_shapes=[pltpu.VMEM((1, C, 1), jnp.float32)],
        ),
        compiler_params=pltpu.CompilerParams(
            dimension_semantics=("parallel", "arbitrary"),
            vmem_limit_bytes=vmem_limit),
        cost_estimate=pool_cost,
    )(x, w1t, w2m)

    # ---- pass 2: out = x * s, lane-dense tiles, both grid axes parallel
    scale_cost = pl.CostEstimate(
        flops=int(N * C * HW),
        transcendentals=0,
        bytes_accessed=int(2 * N * C * HW * itemsize + N * C * 4),
    )
    out = pl.pallas_call(
        _se_scale_kernel,
        out_shape=jax.ShapeDtypeStruct((N, C, HW), x_nchw.dtype),
        grid_spec=pltpu.PrefetchScalarGridSpec(
            num_scalar_prefetch=0,
            grid=(N, num_k),
            in_specs=[
                pl.BlockSpec((1, C, tile_hw), lambda i, k: (i, 0, k)),
                pl.BlockSpec((1, C, 1), lambda i, k: (i, 0, 0)),
            ],
            out_specs=pl.BlockSpec((1, C, tile_hw), lambda i, k: (i, 0, k)),
        ),
        compiler_params=pltpu.CompilerParams(
            dimension_semantics=("parallel", "parallel"),
            vmem_limit_bytes=vmem_limit),
        cost_estimate=scale_cost,
    )(x, s)

    # Free reshape back to NCHW.
    return out.reshape(N, C, H, W)


def se_module_ref(x_nchw, w1, w2):
    """Pure-JAX reference matching the PyTorch forward exactly (NCHW)."""
    pooled = jnp.mean(x_nchw, axis=(2, 3), keepdims=True)            # (N, C, 1, 1)
    h = jnp.einsum('ncij,oc->noij', pooled, w1.reshape(w1.shape[0], -1))
    h = jnp.maximum(h, 0.0)
    s = jnp.einsum('ncij,oc->noij', h, w2.reshape(w2.shape[0], -1))
    s = jax.nn.sigmoid(s)
    return x_nchw * s


if __name__ == "__main__":
    key = jax.random.PRNGKey(0)
    k_x, k_w1, k_w2, k_x2, k_w3, k_w4 = jax.random.split(key, 6)

    # Case 1: module's nominal small shapes (single HW tile).
    N, C, H, W = 2, 4, 16, 16
    reduction = 2
    Cr = C // reduction
    x = jax.random.normal(k_x, (N, C, H, W), dtype=jnp.float32)
    w1 = jax.random.normal(k_w1, (Cr, C, 1, 1), dtype=jnp.float32) * 0.1
    w2 = jax.random.normal(k_w2, (C, Cr, 1, 1), dtype=jnp.float32) * 0.1

    out = se_module_forward(x, w1, w2)
    jax.block_until_ready(out)
    ref = se_module_ref(x, w1, w2)
    assert out.shape == (N, C, H, W)
    assert jnp.allclose(out, ref, atol=1e-5, rtol=1e-5), "mismatch vs reference (case 1)"

    # Case 2: force multiple HW tiles (exercise the reduction accumulator path).
    N2, C2, H2, W2 = 1, 8, 32, 32
    Cr2 = C2 // reduction
    x2 = jax.random.normal(k_x2, (N2, C2, H2, W2), dtype=jnp.float32)
    w3 = jax.random.normal(k_w3, (Cr2, C2, 1, 1), dtype=jnp.float32) * 0.1
    w4 = jax.random.normal(k_w4, (C2, Cr2, 1, 1), dtype=jnp.float32) * 0.1

    out2 = se_module_forward(x2, w3, w4, max_tile_bytes=C2 * 128 * 4)  # tile_hw=128, 8 tiles
    jax.block_until_ready(out2)
    ref2 = se_module_ref(x2, w3, w4)
    assert out2.shape == (N2, C2, H2, W2)
    assert jnp.allclose(out2, ref2, atol=1e-5, rtol=1e-5), "mismatch vs reference (case 2)"

    print("KERNEL_OK")
</pallas_src>

<mosaic_0001>
module attributes {stable_mosaic.version = 11 : i64} {
  func.func @_se_pool_kernel(%arg0: i32, %arg1: i32, %arg2: memref<1x4x256xf32, #tpu.memory_space<vmem>>, %arg3: memref<4x2xf32, #tpu.memory_space<vmem>>, %arg4: memref<4x2xf32, #tpu.memory_space<vmem>>, %arg5: memref<1x4x1xf32, #tpu.memory_space<vmem>>, %arg6: memref<1x4x1xf32, #tpu.memory_space<vmem>>) attributes {dimension_semantics = [#tpu.dimension_semantics<parallel>, #tpu.dimension_semantics<arbitrary>], iteration_bounds = array<i64: 2, 1>, scalar_prefetch = 0 : i64, scratch_operands = 1 : i64, tpu.core_type = #tpu.core_type<tc>, window_params = [{transform_indices = @transform_0, window_bounds = array<i64: 1, 4, 256>}, {pipeline_mode = #tpu.pipeline_mode<synchronous>, transform_indices = @transform_1, window_bounds = array<i64: 4, 2>}, {pipeline_mode = #tpu.pipeline_mode<synchronous>, transform_indices = @transform_2, window_bounds = array<i64: 4, 2>}, {transform_indices = @transform_3, window_bounds = array<i64: 1, 4, 1>}]} {
    %c0_i32 = arith.constant 0 : i32
    %0 = arith.cmpi eq, %arg1, %c0_i32 : i32
    %1 = arith.extui %0 : i1 to i32
    %c0_i32_0 = arith.constant 0 : i32
    %2 = arith.cmpi ne, %1, %c0_i32_0 : i32
    scf.if %2 {
      %cst_11 = arith.constant 0.000000e+00 : f32
      %12 = vector.broadcast %cst_11 : f32 to vector<1x4x1xf32>
      %c0_12 = arith.constant 0 : index
      %c0_13 = arith.constant 0 : index
      %c0_14 = arith.constant 0 : index
      %13 = vector.load %arg6[%c0_12, %c0_13, %c0_14] : memref<1x4x1xf32, #tpu.memory_space<vmem>>, vector<1x4x1xf32>
      tpu.vector_store %arg6[%c0_12, %c0_13, %c0_14], %12 {strides = array<i32>} : memref<1x4x1xf32, #tpu.memory_space<vmem>>, vector<1x4x1xf32>,
    } else {
    }
    %c0 = arith.constant 0 : index
    %c0_1 = arith.constant 0 : index
    %c0_2 = arith.constant 0 : index
    %3 = vector.load %arg6[%c0, %c0_1, %c0_2] : memref<1x4x1xf32, #tpu.memory_space<vmem>>, vector<1x4x1xf32>
    %c0_3 = arith.constant 0 : index
    %c0_4 = arith.constant 0 : index
    %c0_5 = arith.constant 0 : index
    %4 = vector.load %arg2[%c0_3, %c0_4, %c0_5] : memref<1x4x256xf32, #tpu.memory_space<vmem>>, vector<1x4x256xf32>
    %cst = arith.constant dense<0.000000e+00> : vector<1x4xf32>
    %5 = vector.multi_reduction <add>, %4, %cst [2] : vector<1x4x256xf32> to vector<1x4xf32>
    %6 = vector.shape_cast %5 : vector<1x4xf32> to vector<1x4x1xf32>
    %7 = arith.addf %3, %6 : vector<1x4x1xf32>
    %c0_6 = arith.constant 0 : index
    %c0_7 = arith.constant 0 : index
    %c0_8 = arith.constant 0 : index
    %8 = vector.load %arg6[%c0_6, %c0_7, %c0_8] : memref<1x4x1xf32, #tpu.memory_space<vmem>>, vector<1x4x1xf32>
    tpu.vector_store %arg6[%c0_6, %c0_7, %c0_8], %7 {strides = array<i32>} : memref<1x4x1xf32, #tpu.memory_space<vmem>>, vector<1x4x1xf32>,
    %c0_i32_9 = arith.constant 0 : i32
    %9 = arith.cmpi eq, %arg1, %c0_i32_9 : i32
    %10 = arith.extui %9 : i1 to i32
    %c0_i32_10 = arith.constant 0 : i32
    %11 = arith.cmpi ne, %10, %c0_i32_10 : i32
    scf.if %11 {
      %c0_11 = arith.constant 0 : index
      %c0_12 = arith.constant 0 : index
      %c0_13 = arith.constant 0 : index
      %12 = vector.load %arg6[%c0_11, %c0_12, %c0_13] : memref<1x4x1xf32, #tpu.memory_space<vmem>>, vector<1x4x1xf32>
      %13 = vector.shape_cast %12 : vector<1x4x1xf32> to vector<4x1xf32>
      %cst_14 = arith.constant 3.906250e-03 : f32
      %14 = vector.broadcast %cst_14 : f32 to vector<4x1xf32>
      %15 = arith.mulf %13, %14 : vector<4x1xf32>
      %c0_15 = arith.constant 0 : index
      %c0_16 = arith.constant 0 : index
      %16 = vector.load %arg3[%c0_15, %c0_16] : memref<4x2xf32, #tpu.memory_space<vmem>>, vector<4x2xf32>
      %c0_17 = arith.constant 0 : index
      %c0_18 = arith.constant 0 : index
      %17 = vector.load %arg4[%c0_17, %c0_18] : memref<4x2xf32, #tpu.memory_space<vmem>>, vector<4x2xf32>
      %18 = vector.broadcast %15 : vector<4x1xf32> to vector<4x2xf32>
      %19 = arith.mulf %16, %18 : vector<4x2xf32>
      %cst_19 = arith.constant dense<0.000000e+00> : vector<2xf32>
      %20 = vector.multi_reduction <add>, %19, %cst_19 [0] : vector<4x2xf32> to vector<2xf32>
      %21 = vector.shape_cast %20 : vector<2xf32> to vector<1x2xf32>
      %cst_20 = arith.constant 0.000000e+00 : f32
      %22 = vector.broadcast %cst_20 : f32 to vector<1x2xf32>
      %23 = arith.maximumf %21, %22 : vector<1x2xf32>
      %24 = vector.broadcast %23 : vector<1x2xf32> to vector<4x2xf32>
      %25 = arith.mulf %17, %24 : vector<4x2xf32>
      %cst_21 = arith.constant dense<0.000000e+00> : vector<4xf32>
      %26 = vector.multi_reduction <add>, %25, %cst_21 [1] : vector<4x2xf32> to vector<4xf32>
      %27 = vector.shape_cast %26 : vector<4xf32> to vector<4x1xf32>
      %28 = arith.negf %27 : vector<4x1xf32>
      %29 = math.exp %28 : vector<4x1xf32>
      %cst_22 = arith.constant 1.000000e+00 : f32
      %30 = vector.broadcast %cst_22 : f32 to vector<4x1xf32>
      %31 = arith.addf %30, %29 : vector<4x1xf32>
      %32 = arith.divf %30, %31 : vector<4x1xf32>
      %33 = vector.shape_cast %32 : vector<4x1xf32> to vector<1x4x1xf32>
      %c0_23 = arith.constant 0 : index
      %c0_24 = arith.constant 0 : index
      %c0_25 = arith.constant 0 : index
      %34 = vector.load %arg5[%c0_23, %c0_24, %c0_25] : memref<1x4x1xf32, #tpu.memory_space<vmem>>, vector<1x4x1xf32>
      tpu.vector_store %arg5[%c0_23, %c0_24, %c0_25], %33 {strides = array<i32>} : memref<1x4x1xf32, #tpu.memory_space<vmem>>, vector<1x4x1xf32>,
    } else {
    }
    return
  }
  func.func @transform_0(%arg0: i32, %arg1: i32) -> (i32, i32, i32) {
    %c0_i32 = arith.constant 0 : i32
    %c0_i32_0 = arith.constant 0 : i32
    return %arg0, %c0_i32, %arg1 : i32, i32, i32
  }
  func.func @transform_1(%arg0: i32, %arg1: i32) -> (i32, i32) {
    %c0_i32 = arith.constant 0 : i32
    %c0_i32_0 = arith.constant 0 : i32
    %c0_i32_1 = arith.constant 0 : i32
    return %c0_i32, %c0_i32_0 : i32, i32
  }
  func.func @transform_2(%arg0: i32, %arg1: i32) -> (i32, i32) {
    %c0_i32 = arith.constant 0 : i32
    %c0_i32_0 = arith.constant 0 : i32
    %c0_i32_1 = arith.constant 0 : i32
    return %c0_i32, %c0_i32_0 : i32, i32
  }
  func.func @transform_3(%arg0: i32, %arg1: i32) -> (i32, i32, i32) {
    %c0_i32 = arith.constant 0 : i32
    %c0_i32_0 = arith.constant 0 : i32
    %c0_i32_1 = arith.constant 0 : i32
    return %arg0, %c0_i32, %c0_i32_0 : i32, i32, i32
  }
}

</mosaic_0001>

<bundles_post_ra>
// kernel: tpu_custom_call.1
= control target key start
LH: loop header
LB: loop body
LE: loop exit
PB: predicated region body
PF: predicated region fallthrough
CT: control target
= control target key end

     0   :  { %8 = vsyncpa [#allocation4], 0  ;;  %s628_s0 = inlined_call_operand.hbm [shape: f32[2,4,256], index: 0, kind: input, shape index: {}]   ;;  %s629_s1 = inlined_call_operand.vmem [shape: f32[4,2], index: 1, kind: input, shape index: {}]   ;;  %s630_s2 = inlined_call_operand.vmem [shape: f32[4,2], index: 2, kind: input, shape index: {}]   ;;  %s631_s3 = inlined_call_operand.vmem [shape: f32[2,4,1], index: 3, kind: output, shape index: {}]  }
   0x1   :  { %10 = vsyncpa [#allocation4 + $0x1], 0  ;;  %s531_s12 = smov 0   ;;  %s533_s13 = smov 0  }
   0x2   :  { %s535_s14 = smov 0   ;;  %s537_s15 = smov 0  }
   0x3   :  { %s539_s16 = smov 0   ;;  %s541_s17 = smov 0  }
   0x4 LB: > { %s351_s18 = sadd.s32 4294967295, %s507_s17   ;;  %s28_s19 = sadd.s32 1, %s503_s16  ;;  %s507_s17 = sphi %s541_s17, %s16_s17   ;;  %s503_s16 = sphi %s539_s16, %s638_s16   ;;  %s499_s15 = sphi %s537_s15, %s637_s15   ;;  %s495_s14 = sphi %s535_s14, %s636_s14   ;;  %s491_s13 = sphi %s533_s13, %s635_s13   ;;  %s487_s12 = sphi %s531_s12, %s634_s12  }
   0x5   : > { %p30_p0 = scmp.ge.s32.totalorder %s28_s19, 2  ;;  %s37_s20 = sadd.s32 1, %s495_s14 }
   0x6   : > { %p44_p1 = scmp.ne.s32.totalorder %s495_s14, %s491_s13  ;;  %p45_p2 = scmp.eq.s32.totalorder %s507_s17, 0 }
   0x7   : > { %s640_s19 = smov (%p30_p0, %s28_s19), 0  ;;  %p50_p4 = scmp.ne.s32.totalorder %s491_s13, %s487_s12 }
   0x8   : > { %p567_p3 = por %p45_p2, %p44_p1  ;;  %s32_s22 = ssub.s32 %s503_s16, %s640_s19 }
   0x9   : > { %p51_p5 = scmp.eq.s32.totalorder %s351_s18, 0  ;;  %p35_p6 = scmp.eq.s32.totalorder %s32_s22, 0 }
   0xa   : > { %p371_p8 = scmp.lt.s32.totalorder %s507_s17, 2  ;;  %s148_s25 = sand.u32 1, %s495_s14  }
   0xb   : > { %p574_p7 = por %p51_p5, %p50_p4  ;;  %s364_s26 = sshll.u32 %s503_s16, 3 }
   0xc   : > { %s580_s24 = scalar_select %p35_p6, %s495_s14, %s37_s20  }
   0xd   : > { %s355_s27 = sshll.u32 %s148_s25, 3  ;;  %s159_s30 = scalar_lea.hbm %s628_s0, %s364_s26 }
   0xe   : > { %s161_s4 = sshll.u32 %s159_s30, 4  ;;  %s152_s5 = scalar_lea.vmem [#allocation3], %s355_s27  ;;  %s162_s4 = int_to_ptr.hbm [resolvable:$true] %s161_s4 }
   0xf   : > { %s163_s6 = sshll.u32 %s152_s5, 4  ;;  %p368_p9 = pnand %p371_p8, %p567_p3  ;;  %s164_s6 = int_to_ptr.vmem [resolvable:$true] %s163_s6 }
  0x10   : > { %p358_p10 = scmp.ge.s32.totalorder %s507_s17, 1  ;;  %p168_p11 = scmp.lt.s32.totalorder %s507_s17, 3 }
  0x11   : > { %s149_s7 = scalar_lea.sflag [#allocation4], %s148_s25 }
  0x12   : > { %370 = dma.hbm_to_vmem [thread:$0]  (!%p368_p9), %s162_s4, 128, %s164_s6, %s149_s7  }
  0x13   : > { %p169_p12 = pnand %p358_p10, %p168_p11 }
  0x14   : > { %s174_s8 = sand.u32 (!%p169_p12), 1, %s491_s13  }
  0x15   : > { %172 = sbr.rel (%p169_p12) target bundleno = 448 (0x1c0), region = 32  ;;  %s359_s9 = sshll.u32 (!%p169_p12), %s174_s8, 3 }
  0x16   : > { %s175_s10 = scalar_lea.sflag (!%p169_p12), [#allocation4], %s174_s8  ;;  %s178_s11 = scalar_lea.vmem (!%p169_p12), [#allocation3], %s359_s9 }
  0x1a   : > { %482 = dma.done.wait (%p574_p7), %s175_s10, 128  }
  0x1b   : > { %484 = vsyncadd (%p574_p7), %s175_s10, 4294967168  ;;  %vm210_vm0 = vcmask 3072   ;;  %v509_v0 = vmov 0.0   ;;  %v213_v1 = vld [vmem:[%s178_s11] sm:$0xff]  ;;  %vm220_vm1 = vcmask 1043456   ;;  %v510_v7 = vmov 0  }
  0x1c   : > { %211 = vst.msk [vmem:[#allocation2] sm:$0xf] %vm210_vm0, %v509_v0  ;;  %422 = vset.pattern.permute.xlu0 %v510_v7  ;;  %v234_v13 = vld [vmem:[%s629_s1] sm:$0xf]  ;;  %vm242_vm2 = vcmask 11264   ;;  %p202_p13 = scmp.lt.s32.totalorder %s499_s15, 1 }
  0x1d   : > { %215 = vst [vmem:[#allocation1] ss:$2 sm:$0xff] %v213_v1  ;;  %v235_v23 = vld [vmem:[%s630_s2] sm:$0xf] }
  0x1e   : > { %s642_s15 = smov (!%p202_p13, %s499_s15), 1 }
  0x1f   : > { %s360_s22 = sshll.u32 %s642_s15, 2 }
  0x20   : > { %s205_s26 = scalar_lea.vmem %s631_s3, %s360_s22 }
  0x23   : > { %v212_v8 = vld [vmem:[#allocation2] sm:$0xf] }
  0x24   : > { %v216_v2 = vld.sshfl [vmem:[#allocation1] sm:$0xff pattern:$0x75316420]  ;;  %v217_v3 = vld.sshfl [vmem:[#allocation1 + $0x8] sm:$0xff pattern:$0x75316420] }
  0x25   : > { %v221_v4 = vsel %vm220_vm1, %v216_v2, 0.0  ;;  %v222_v5 = vsel %vm220_vm1, %v217_v3, 0.0 }
  0x26   : > { %v223_v6 = vadd.f32 %v222_v5, %v221_v4 }
  0x28   : > { %224 = vadd.xlane.f32.xlu0 %v223_v6 }
  0x9b   : > { %v225_v9 = vpop.xlane.xlu0 %224 }
  0x9c   : > { %v226_v10 = vadd.f32 %v225_v9, %v212_v8 }
  0x9e   : > { %228 = vst.msk [vmem:[#allocation2] sm:$0xf] %vm210_vm0, %v226_v10 }
  0xa5   : > { %v232_v11 = vld [vmem:[#allocation2] sm:$0xf] }
  0xa6   : > { %v233_v12 = vmul.f32 0.00390625, %v232_v11 }
  0xa8   : > { %238 = vperm.xlu0 %422, %v233_v12  }
 0x11a   : > { %v239_v14 = vpop.permute.xlu0 %238 }
 0x11b   : > { %v241_v15 = vmul.f32 %v239_v14, %v234_v13 }
 0x11d   : > { %v243_v16 = vsel %vm242_vm2, %v241_v15, 0.0 }
 0x11e   : > { %v244_v17 = vrot.slane %v243_v16, 4 }
 0x120   : > { %v245_v18 = vadd.f32 %v244_v17, %v243_v16 }
 0x122   : > { %v246_v19 = vrot.slane %v245_v18, 2 }
 0x124   : > { %v247_v20 = vadd.f32 %v246_v19, %v245_v18 }
 0x126   : > { %v248_v21 = vrot.slane %v247_v20, 1 }
 0x128   : > { %v249_v22 = vadd.f32 %v248_v21, %v247_v20 }
 0x12a   : > { %v250_v24 = vmax.f32 %v249_v22, 0.0 }
 0x12c   : > { %v251_v25 = vmul.f32 %v250_v24, %v235_v23 }
 0x12e   : > { %v252_v26 = vsel %vm242_vm2, %v251_v25, 0.0 }
 0x12f   : > { %253 = vadd.xlane.f32.xlu1 %v252_v26 }
 0x1a2   : > { %v254_v27 = vpop.xlane.xlu1 %253 }
 0x1a3   : > { %v361_v28 = vmul.f32 -1.442695, %v254_v27 }
 0x1a5   : > { %423 = vpow2.f32 %v361_v28 }
 0x1ab   : > { %v424_v29 = vpop.eup %423 }
 0x1ac   : > { %v258_v30 = vadd.f32 1.0, %v424_v29 }
 0x1ae   : > { %425 = vrcp.f32 %v258_v30  ;;  %v270_v34 = vand.u32 2147483648, %v258_v30  ;;  %v268_v36 = vand.u32 2147483647, %v258_v30  ;;  %vm264_vm4 = vweird.f32 %v258_v30 }
 0x1b0   : > { %v271_v38 = vor.u32 1.1754944e-38, %v270_v34  ;;  %vm269_vm6 = vcmp.eq.f32.partialorder %v268_v36, 8.507059e+37 }
 0x1b4   : > { %v426_v31 = vpop.eup %425 }
 0x1b5   : > { %v260_v32 = vmul.f32 %v426_v31, %v258_v30  ;;  %vm265_vm3 = vweird.f32 %v426_v31 }
 0x1b6   : > { %vm266_vm5 = vmor %vm264_vm4, %vm265_vm3 }
 0x1b7   : > { %v261_v33 = vsub.f32 1.0, %v260_v32 }
 0x1b9   : > { %v262_v35 = vmul.f32 %v426_v31, %v261_v33 }
 0x1bb   : > { %v263_v37 = vadd.f32 %v426_v31, %v262_v35 }
 0x1bd   : > { %v267_v39 = vsel %vm266_vm5, %v426_v31, %v263_v37 }
 0x1be   : > { %v272_v40 = vsel %vm269_vm6, %v271_v38, %v267_v39 }
 0x1bf   : > { %274 = vst.msk [vmem:[%s205_s26] sm:$0xf] %vm210_vm0, %v272_v40 }
 0x1c0 PF: > { %s16_s17 = sadd.s32 1, %s507_s17   ;;  %s634_s12 = smov %s491_s13 }
 0x1c1   : > { %p13_p0 = scmp.ge.s32.totalorder %s16_s17, 4   ;;  %s635_s13 = smov %s495_s14 }
 0x1c2   : > { %s636_s14 = smov %s580_s24  ;;  %s637_s15 = smov %s503_s16 }
 0x1c3   : > { %s638_s16 = smov %s640_s19  ;;  %15 = sbr.rel (!%p13_p0) target bundleno = 4 (0x4), region = 80 }
 0x1c8   :  { %294 = vsyncpa [#allocation4], 1 }
 0x1c9   :  { %296 = vsyncpa [#allocation4 + $0x1], 1 }

</bundles_post_ra>
